<compile_context>
chip_gen: v7x
topology: tpu7x:2x2x1
jax: 0.10.0
libtpu: 0.0.40
codegen_flags: <defaults>
</compile_context>

<pallas_src>
import jax
import jax.numpy as jnp
from jax.experimental import pallas as pl
from jax.experimental.pallas import tpu as pltpu


def _round_up(n, m):
    return ((n + m - 1) // m) * m


def _film_kernel(gamma_ref, beta_ref, x_ref, out_ref):
    # gamma_ref/beta_ref: (TILE_R, 1); x_ref/out_ref: (TILE_R, TILE_HW)
    out_ref[...] = (gamma_ref[...] * x_ref[...] + beta_ref[...]).astype(out_ref.dtype)


def film_layer(x, condition, weight, bias, *, tile_r_max=256, tile_hw_max=4096):
    """x: (B, C, H, W), condition: (B, D), weight: (2C, D), bias: (2C,)."""
    B, C, H, W = x.shape
    HW = H * W
    rows = B * C

    # Projection hoisted out of the kernel (done once, tiny, in plain JAX).
    gb = (condition @ weight.T + bias).astype(x.dtype)          # (B, 2C)
    gamma = gb[:, :C].reshape(rows, 1)                          # (B*C, 1)
    beta = gb[:, C:].reshape(rows, 1)                           # (B*C, 1)

    x_flat = x.reshape(rows, HW)

    # Sublane-dense row tiles (mult of 8), lane-dense spatial tiles (mult of 128).
    tile_r = min(tile_r_max, _round_up(rows, 8))
    tile_hw = min(tile_hw_max, _round_up(HW, 128))
    rows_pad = _round_up(rows, tile_r)
    hw_pad = _round_up(HW, tile_hw)

    if rows_pad != rows or hw_pad != HW:
        x_flat = jnp.pad(x_flat, ((0, rows_pad - rows), (0, hw_pad - HW)))
    if rows_pad != rows:
        gamma = jnp.pad(gamma, ((0, rows_pad - rows), (0, 0)))
        beta = jnp.pad(beta, ((0, rows_pad - rows), (0, 0)))

    grid = (rows_pad // tile_r, hw_pad // tile_hw)

    out_flat = pl.pallas_call(
        _film_kernel,
        out_shape=jax.ShapeDtypeStruct((rows_pad, hw_pad), x.dtype),
        grid=grid,
        in_specs=[
            pl.BlockSpec((tile_r, 1), lambda r, h: (r, 0)),          # gamma column
            pl.BlockSpec((tile_r, 1), lambda r, h: (r, 0)),          # beta column
            pl.BlockSpec((tile_r, tile_hw), lambda r, h: (r, h)),    # x tile
        ],
        out_specs=pl.BlockSpec((tile_r, tile_hw), lambda r, h: (r, h)),
        compiler_params=pltpu.CompilerParams(
            dimension_semantics=("parallel", "parallel"),
        ),
    )(gamma, beta, x_flat)

    return out_flat[:rows, :HW].reshape(B, C, H, W)


if __name__ == "__main__":
    B, C, H, W = 2, 4, 16, 16
    D = 8  # condition_dim

    key = jax.random.PRNGKey(0)
    kx, kc, kw, kb = jax.random.split(key, 4)

    x = jax.random.normal(kx, (B, C, H, W), dtype=jnp.float32)
    condition = jax.random.normal(kc, (B, D), dtype=jnp.float32)

    # Deterministic init mimicking nn.Linear(D, 2C): U(-1/sqrt(D), 1/sqrt(D))
    bound = 1.0 / (D ** 0.5)
    weight = jax.random.uniform(kw, (2 * C, D), jnp.float32, -bound, bound)
    bias = jax.random.uniform(kb, (2 * C,), jnp.float32, -bound, bound)

    out = film_layer(x, condition, weight, bias)
    out = jax.block_until_ready(out)

    # Pure-JAX reference.
    gb_ref = condition @ weight.T + bias                 # (B, 2C)
    gamma_ref = gb_ref[:, :C][:, :, None, None]
    beta_ref = gb_ref[:, C:][:, :, None, None]
    ref = gamma_ref * x + beta_ref

    assert jnp.allclose(out, ref, atol=1e-5, rtol=1e-5), "mismatch vs reference"
    print("KERNEL_OK")
</pallas_src>

<mosaic_0001>
module attributes {stable_mosaic.version = 11 : i64} {
  func.func @_film_kernel(%arg0: i32, %arg1: i32, %arg2: memref<8x1xf32, #tpu.memory_space<vmem>>, %arg3: memref<8x1xf32, #tpu.memory_space<vmem>>, %arg4: memref<8x256xf32, #tpu.memory_space<vmem>>, %arg5: memref<8x256xf32, #tpu.memory_space<vmem>>) attributes {dimension_semantics = [#tpu.dimension_semantics<parallel>, #tpu.dimension_semantics<parallel>], iteration_bounds = array<i64: 1, 1>, scalar_prefetch = 0 : i64, scratch_operands = 0 : i64, tpu.core_type = #tpu.core_type<tc>, window_params = [{transform_indices = @transform_0, window_bounds = array<i64: 8, 1>}, {transform_indices = @transform_1, window_bounds = array<i64: 8, 1>}, {transform_indices = @transform_2, window_bounds = array<i64: 8, 256>}, {transform_indices = @transform_3, window_bounds = array<i64: 8, 256>}]} {
    %c0 = arith.constant 0 : index
    %c0_0 = arith.constant 0 : index
    %0 = vector.load %arg2[%c0, %c0_0] : memref<8x1xf32, #tpu.memory_space<vmem>>, vector<8x1xf32>
    %c0_1 = arith.constant 0 : index
    %c0_2 = arith.constant 0 : index
    %1 = vector.load %arg4[%c0_1, %c0_2] : memref<8x256xf32, #tpu.memory_space<vmem>>, vector<8x256xf32>
    %2 = vector.broadcast %0 : vector<8x1xf32> to vector<8x256xf32>
    %3 = arith.mulf %2, %1 : vector<8x256xf32>
    %c0_3 = arith.constant 0 : index
    %c0_4 = arith.constant 0 : index
    %4 = vector.load %arg3[%c0_3, %c0_4] : memref<8x1xf32, #tpu.memory_space<vmem>>, vector<8x1xf32>
    %5 = vector.broadcast %4 : vector<8x1xf32> to vector<8x256xf32>
    %6 = arith.addf %3, %5 : vector<8x256xf32>
    %c0_5 = arith.constant 0 : index
    %c0_6 = arith.constant 0 : index
    %7 = vector.load %arg5[%c0_5, %c0_6] : memref<8x256xf32, #tpu.memory_space<vmem>>, vector<8x256xf32>
    tpu.vector_store %arg5[%c0_5, %c0_6], %6 {strides = array<i32>} : memref<8x256xf32, #tpu.memory_space<vmem>>, vector<8x256xf32>,
    return
  }
  func.func @transform_0(%arg0: i32, %arg1: i32) -> (i32, i32) {
    %c0_i32 = arith.constant 0 : i32
    %c0_i32_0 = arith.constant 0 : i32
    return %arg0, %c0_i32 : i32, i32
  }
  func.func @transform_1(%arg0: i32, %arg1: i32) -> (i32, i32) {
    %c0_i32 = arith.constant 0 : i32
    %c0_i32_0 = arith.constant 0 : i32
    return %arg0, %c0_i32 : i32, i32
  }
  func.func @transform_2(%arg0: i32, %arg1: i32) -> (i32, i32) {
    %c0_i32 = arith.constant 0 : i32
    return %arg0, %arg1 : i32, i32
  }
  func.func @transform_3(%arg0: i32, %arg1: i32) -> (i32, i32) {
    %c0_i32 = arith.constant 0 : i32
    return %arg0, %arg1 : i32, i32
  }
}

</mosaic_0001>

<bundles_post_ra>
// kernel: tpu_custom_call.1
= control target key start
LH: loop header
LB: loop body
LE: loop exit
PB: predicated region body
PF: predicated region fallthrough
CT: control target
= control target key end

     0   :  { %v76_v1 = vmov 0   ;;  %s122_s0 = inlined_call_operand.vmem [shape: f32[8,1], index: 0, kind: input, shape index: {}]   ;;  %s123_s1 = inlined_call_operand.vmem [shape: f32[8,1], index: 1, kind: input, shape index: {}]   ;;  %s124_s2 = inlined_call_operand.vmem [shape: f32[8,256], index: 2, kind: input, shape index: {}]   ;;  %s125_s3 = inlined_call_operand.hbm [shape: f32[8,256], index: 3, kind: output, shape index: {}]  }
   0x1   :  { %v15_v0 = vld [vmem:[%s122_s0] sm:$0xff]  ;;  %51 = vset.pattern.permute.xlu0 %v76_v1 }
   0x2   :  { %8 = vsyncpa [#allocation3], 0  ;;  %20 = vperm.xlu0 %51, %v15_v0   ;;  %v25_v2 = vld [vmem:[%s123_s1] sm:$0xff]  ;;  %v17_v4 = vld [vmem:[%s124_s2 + $0x8] sm:$0xff]  ;;  %s77_s20 = smov [#allocation2]  }
   0x3   :  { %v16_v3 = vld [vmem:[%s124_s2] sm:$0xff]  ;;  %s41_s0 = sshll.u32 %s77_s20, 4  ;;  %s42_s0 = int_to_ptr.vmem [resolvable:$true] %s41_s0 }
   0x4   :  { %s52_s1 = scalar_lea.vmem %s42_s0, 256  ;;  %p57_p1 = scmp.lt.s32.totalorder %s42_s0, %s42_s0 }
   0x5   :  { %p53_p0 = scmp.ne.s32.totalorder %s42_s0, %s52_s1  ;;  %p58_p2 = scmp.lt.s32.totalorder %s52_s1, %s52_s1 }
   0x6   :  { %28 = vperm.xlu0 %51, %v25_v2  }
   0x7   :  { %p59_p3 = por %p58_p2, %p57_p1 }
   0x9   :  { %p60_p4 = pnand %p59_p3, %p53_p0 }
  0x81   :  { %v21_v5 = vpop.permute.xlu0 %20 }
  0x82   :  { %v23_v6 = vmul.f32 %v21_v5, %v16_v3  ;;  %v24_v7 = vmul.f32 %v21_v5, %v17_v4 }
  0x85   :  { %v29_v8 = vpop.permute.xlu0 %28 }
  0x86   :  { %v31_v9 = vadd.f32 %v29_v8, %v23_v6  ;;  %v32_v10 = vadd.f32 %v29_v8, %v24_v7 }
  0x88   :  { %33 = vst [vmem:[#allocation2] sm:$0xff] %v31_v9  ;;  %34 = vst [vmem:[#allocation2 + $0x8] sm:$0xff] %v32_v10 }
  0x89   :  { %63 = shalt.err (!%p60_p4)
}
  0x8a   :  { %s64_s22 = scalar_lea.hbm %s125_s3, 256 }
  0x8b   :  { %p65_p5 = scmp.ne.s32.totalorder %s125_s3, %s64_s22  ;;  %p68_p6 = scmp.lt.u32.totalorder %s64_s22, %s125_s3 }
  0x8d   :  { %p70_p7 = pnand %p68_p6, %p65_p5 }
  0x8f   :  { %73 = shalt.err (!%p70_p7)
}
  0x90   :  { %44 = dma.vmem_to_hbm [thread:$0]  %s42_s0, 256, %s125_s3, [#allocation3]  }
  0x91   :  { %74 = dma.done.wait [#allocation3], 256  }
  0x92   :  { %75 = vsyncadd [#allocation3], 4294967040 }
  0x93   :  { %48 = vsyncpa [#allocation3], 1 }

</bundles_post_ra>
